<compile_context>
chip_gen: v7x
topology: tpu7x:2x2x1
jax: 0.10.0
libtpu: 0.0.40
codegen_flags: <defaults>
</compile_context>

<pallas_src>
import functools

import jax
import jax.numpy as jnp
from jax.experimental import pallas as pl
from jax.experimental.pallas import tpu as pltpu


def _gru_kernel(num_layers, hidden_size, mm_dtype, gx0_ref, *refs):
    # refs layout:
    #   layer 0      : wh_0 (3,H,H), b_0 (4,1,H)
    #   layer l >= 1 : wx_l (3,H,H), wh_l (3,H,H), b_l (4,1,H)
    #   out_ref (T, Bb, H)  -- last
    out_ref = refs[-1]

    layer_refs = []
    idx = 0
    for l in range(num_layers):
        if l == 0:
            layer_refs.append((None, refs[idx], refs[idx + 1]))
            idx += 2
        else:
            layer_refs.append((refs[idx], refs[idx + 1], refs[idx + 2]))
            idx += 3

    T = gx0_ref.shape[1]
    Bb = out_ref.shape[1]
    H = hidden_size

    def step(t, hs):
        new_hs = []
        inp = None
        for l, (wx_ref, wh_ref, b_ref) in enumerate(layer_refs):
            h_prev = hs[l]                       # (Bb, H) f32
            h_mm = h_prev.astype(mm_dtype)

            if l == 0:
                # Precomputed input projection: gate-major index, dynamic t.
                gx_r = gx0_ref[0, t]
                gx_i = gx0_ref[1, t]
                gx_n = gx0_ref[2, t]
            else:
                x_mm = inp.astype(mm_dtype)
                gx_r = jnp.dot(x_mm, wx_ref[0], preferred_element_type=jnp.float32)
                gx_i = jnp.dot(x_mm, wx_ref[1], preferred_element_type=jnp.float32)
                gx_n = jnp.dot(x_mm, wx_ref[2], preferred_element_type=jnp.float32)

            gh_r = jnp.dot(h_mm, wh_ref[0], preferred_element_type=jnp.float32)
            gh_i = jnp.dot(h_mm, wh_ref[1], preferred_element_type=jnp.float32)
            gh_n = jnp.dot(h_mm, wh_ref[2], preferred_element_type=jnp.float32)

            b_r = b_ref[0]      # (1, H) = bx_r + bh_r (pre-summed at init)
            b_i = b_ref[1]      # (1, H) = bx_i + bh_i
            bx_n = b_ref[2]     # (1, H)
            bh_n = b_ref[3]     # (1, H)

            r = jax.nn.sigmoid(gx_r + gh_r + b_r)
            z = jax.nn.sigmoid(gx_i + gh_i + b_i)
            n = jnp.tanh(gx_n + bx_n + r * (gh_n + bh_n))
            hy = n + z * (h_prev - n)            # == (1-z)*n + z*h_prev

            new_hs.append(hy)
            inp = hy

        out_ref[t] = inp.astype(out_ref.dtype)
        return tuple(new_hs)

    h0 = tuple(jnp.zeros((Bb, H), jnp.float32) for _ in range(num_layers))
    jax.lax.fori_loop(0, T, step, h0)


def gru_forward(x, params, *, num_layers, hidden_size, output_size,
                batch_block=None, mm_dtype=jnp.bfloat16):
    """x: (B, T, D) float32 -> (T*B, output_size) float32 (matches torch module)."""
    B, T, D = x.shape
    H = hidden_size
    if batch_block is None:
        batch_block = B           # on v7x with large B, set batch_block=B//2 (multiple of 8)
    assert B % batch_block == 0
    assert batch_block == B or batch_block % 8 == 0

    wx0, _, _ = params["layers"][0]   # (3, D, H)

    # Hoisted layer-0 input projection: one large matmul over all timesteps.
    x_tm = jnp.transpose(x, (1, 0, 2))                    # (T, B, D) time-major
    x2d = x_tm.reshape(T * B, D).astype(mm_dtype)
    gx0 = jnp.einsum("nd,gdh->gnh", x2d, wx0.astype(mm_dtype),
                     preferred_element_type=jnp.float32)  # (3, T*B, H) f32
    gx0 = gx0.reshape(3, T, B, H)

    inputs = [gx0]
    in_specs = [pl.BlockSpec((3, T, batch_block, H), lambda b: (0, 0, b, 0))]

    def full_spec(a):
        nd = a.ndim
        return pl.BlockSpec(a.shape, lambda b, _nd=nd: (0,) * _nd)

    for l, (wx, wh, bias) in enumerate(params["layers"]):
        if l > 0:
            a = wx.astype(mm_dtype)
            inputs.append(a)
            in_specs.append(full_spec(a))
        a = wh.astype(mm_dtype)
        inputs.append(a)
        in_specs.append(full_spec(a))
        inputs.append(bias)
        in_specs.append(full_spec(bias))

    kernel = functools.partial(_gru_kernel, num_layers, hidden_size, mm_dtype)

    hidden = pl.pallas_call(
        kernel,
        out_shape=jax.ShapeDtypeStruct((T, B, H), jnp.float32),
        grid_spec=pltpu.PrefetchScalarGridSpec(
            num_scalar_prefetch=0,
            grid=(B // batch_block,),
            in_specs=in_specs,
            out_specs=pl.BlockSpec((T, batch_block, H), lambda b: (b and 0, b, 0) if False else (0, b, 0)),
        ),
        compiler_params=pltpu.CompilerParams(
            dimension_semantics=("parallel",)),   # batch blocks are independent
    )(*inputs)

    # Hoisted final fc: one lane-dense (T*B, H) @ (H, O) matmul.
    y = jnp.dot(hidden.reshape(T * B, H).astype(mm_dtype),
                params["wfc"].astype(mm_dtype),
                preferred_element_type=jnp.float32) + params["bfc"]
    return y


def init_params(key, input_size, hidden_size, num_layers, output_size):
    """Uniform(-1/sqrt(H), 1/sqrt(H)) init (mirrors GRUCell.reset_parameters),
    stored gate-major with r/i biases pre-summed."""
    std = 1.0 / jnp.sqrt(jnp.float32(hidden_size))
    H = hidden_size
    layers = []
    for l in range(num_layers):
        d_in = input_size if l == 0 else H
        key, k1, k2, k3, k4 = jax.random.split(key, 5)
        wx = jax.random.uniform(k1, (3, d_in, H), jnp.float32, -std, std)
        wh = jax.random.uniform(k2, (3, H, H), jnp.float32, -std, std)
        bx = jax.random.uniform(k3, (3, H), jnp.float32, -std, std)
        bh = jax.random.uniform(k4, (3, H), jnp.float32, -std, std)
        bias = jnp.stack([bx[0] + bh[0], bx[1] + bh[1], bx[2], bh[2]])  # (4, H)
        layers.append((wx, wh, bias.reshape(4, 1, H)))
    key, k5, k6 = jax.random.split(key, 3)
    wfc = jax.random.uniform(k5, (H, output_size), jnp.float32, -std, std)
    bfc = jax.random.uniform(k6, (1, output_size), jnp.float32, -std, std)
    return {"layers": layers, "wfc": wfc, "bfc": bfc}


def gru_reference(x, params, *, num_layers, hidden_size, mm_dtype=jnp.bfloat16):
    """Pure-JAX replica of the PyTorch forward (same bf16-operand matmuls)."""
    B, T, _ = x.shape
    H = hidden_size
    h = [jnp.zeros((B, H), jnp.float32) for _ in range(num_layers)]
    outs = []
    for t in range(T):
        inp = x[:, t, :]
        for l in range(num_layers):
            wx, wh, b = params["layers"][l]
            gx = jnp.einsum("bd,gdh->gbh", inp.astype(mm_dtype), wx.astype(mm_dtype),
                            preferred_element_type=jnp.float32)
            gh = jnp.einsum("bh,ghk->gbk", h[l].astype(mm_dtype), wh.astype(mm_dtype),
                            preferred_element_type=jnp.float32)
            r = jax.nn.sigmoid(gx[0] + gh[0] + b[0])
            z = jax.nn.sigmoid(gx[1] + gh[1] + b[1])
            n = jnp.tanh(gx[2] + b[2] + r * (gh[2] + b[3]))
            h[l] = n + z * (h[l] - n)
            inp = h[l]
        outs.append(inp)
    out = jnp.stack(outs).reshape(T * B, H)
    return jnp.dot(out.astype(mm_dtype), params["wfc"].astype(mm_dtype),
                   preferred_element_type=jnp.float32) + params["bfc"]


if __name__ == "__main__":
    B, T = 8, 8
    input_size, hidden_size, num_layers, output_size = 16, 32, 2, 16

    key = jax.random.PRNGKey(0)
    key, kx, kp = jax.random.split(key, 3)
    x = jax.random.normal(kx, (B, T, input_size), jnp.float32)
    params = init_params(kp, input_size, hidden_size, num_layers, output_size)

    out = gru_forward(x, params, num_layers=num_layers,
                      hidden_size=hidden_size, output_size=output_size)
    out = jax.block_until_ready(out)

    ref = gru_reference(x, params, num_layers=num_layers, hidden_size=hidden_size)
    assert out.shape == (T * B, output_size), out.shape
    max_err = float(jnp.abs(out - ref).max())
    assert jnp.allclose(out, ref, atol=1e-3, rtol=1e-3), max_err

    print("KERNEL_OK")
</pallas_src>

<mosaic_0001>
module attributes {stable_mosaic.version = 11 : i64} {
  func.func @_gru_kernel(%arg0: i32, %arg1: memref<3x8x8x32xf32, #tpu.memory_space<vmem>>, %arg2: memref<3x32x32xbf16, #tpu.memory_space<vmem>>, %arg3: memref<4x1x32xf32, #tpu.memory_space<vmem>>, %arg4: memref<3x32x32xbf16, #tpu.memory_space<vmem>>, %arg5: memref<3x32x32xbf16, #tpu.memory_space<vmem>>, %arg6: memref<4x1x32xf32, #tpu.memory_space<vmem>>, %arg7: memref<8x8x32xf32, #tpu.memory_space<vmem>>) attributes {dimension_semantics = [#tpu.dimension_semantics<parallel>], iteration_bounds = array<i64: 1>, scalar_prefetch = 0 : i64, scratch_operands = 0 : i64, tpu.core_type = #tpu.core_type<tc>, window_params = [{transform_indices = @transform_0, window_bounds = array<i64: 3, 8, 8, 32>}, {pipeline_mode = #tpu.pipeline_mode<synchronous>, transform_indices = @transform_1, window_bounds = array<i64: 3, 32, 32>}, {pipeline_mode = #tpu.pipeline_mode<synchronous>, transform_indices = @transform_2, window_bounds = array<i64: 4, 1, 32>}, {pipeline_mode = #tpu.pipeline_mode<synchronous>, transform_indices = @transform_3, window_bounds = array<i64: 3, 32, 32>}, {pipeline_mode = #tpu.pipeline_mode<synchronous>, transform_indices = @transform_4, window_bounds = array<i64: 3, 32, 32>}, {pipeline_mode = #tpu.pipeline_mode<synchronous>, transform_indices = @transform_5, window_bounds = array<i64: 4, 1, 32>}, {transform_indices = @transform_6, window_bounds = array<i64: 8, 8, 32>}]} {
    %cst = arith.constant 0.000000e+00 : f32
    %0 = vector.broadcast %cst : f32 to vector<8x32xf32>
    %cst_0 = arith.constant 0.000000e+00 : f32
    %1 = vector.broadcast %cst_0 : f32 to vector<8x32xf32>
    %c0_i32 = arith.constant 0 : i32
    %c8_i32 = arith.constant 8 : i32
    %2 = arith.addi %c0_i32, %c8_i32 : i32
    %c1_i32 = arith.constant 1 : i32
    %3:2 = scf.for %arg8 = %c0_i32 to %2 step %c1_i32 iter_args(%arg9 = %0, %arg10 = %1) -> (vector<8x32xf32>, vector<8x32xf32>)  : i32 {
      %4 = arith.truncf %arg9 : vector<8x32xf32> to vector<8x32xbf16>
      %c0 = arith.constant 0 : index
      %5 = arith.index_cast %arg8 : i32 to index
      %c0_2 = arith.constant 0 : index
      %c0_3 = arith.constant 0 : index
      %6 = vector.load %arg1[%c0, %5, %c0_2, %c0_3] : memref<3x8x8x32xf32, #tpu.memory_space<vmem>>, vector<1x1x8x32xf32>
      %7 = vector.shape_cast %6 : vector<1x1x8x32xf32> to vector<8x32xf32>
      %c1 = arith.constant 1 : index
      %8 = arith.index_cast %arg8 : i32 to index
      %c0_4 = arith.constant 0 : index
      %c0_5 = arith.constant 0 : index
      %9 = vector.load %arg1[%c1, %8, %c0_4, %c0_5] : memref<3x8x8x32xf32, #tpu.memory_space<vmem>>, vector<1x1x8x32xf32>
      %10 = vector.shape_cast %9 : vector<1x1x8x32xf32> to vector<8x32xf32>
      %c2 = arith.constant 2 : index
      %11 = arith.index_cast %arg8 : i32 to index
      %c0_6 = arith.constant 0 : index
      %c0_7 = arith.constant 0 : index
      %12 = vector.load %arg1[%c2, %11, %c0_6, %c0_7] : memref<3x8x8x32xf32, #tpu.memory_space<vmem>>, vector<1x1x8x32xf32>
      %13 = vector.shape_cast %12 : vector<1x1x8x32xf32> to vector<8x32xf32>
      %c0_8 = arith.constant 0 : index
      %c0_9 = arith.constant 0 : index
      %c0_10 = arith.constant 0 : index
      %14 = vector.load %arg2[%c0_8, %c0_9, %c0_10] : memref<3x32x32xbf16, #tpu.memory_space<vmem>>, vector<1x32x32xbf16>
      %15 = vector.shape_cast %14 : vector<1x32x32xbf16> to vector<32x32xbf16>
      %cst_11 = arith.constant dense<0.000000e+00> : vector<8x32xf32>
      %16 = tpu.matmul %4, %15, %cst_11 {dimension_numbers = #tpu.dot_dimension_numbers<[1], [0], [0], [1], [0, 0, 1, 1], [], []>} : vector<8x32xbf16>, vector<32x32xbf16>, vector<8x32xf32> -> vector<8x32xf32>
      %c1_12 = arith.constant 1 : index
      %c0_13 = arith.constant 0 : index
      %c0_14 = arith.constant 0 : index
      %17 = vector.load %arg2[%c1_12, %c0_13, %c0_14] : memref<3x32x32xbf16, #tpu.memory_space<vmem>>, vector<1x32x32xbf16>
      %18 = vector.shape_cast %17 : vector<1x32x32xbf16> to vector<32x32xbf16>
      %cst_15 = arith.constant dense<0.000000e+00> : vector<8x32xf32>
      %19 = tpu.matmul %4, %18, %cst_15 {dimension_numbers = #tpu.dot_dimension_numbers<[1], [0], [0], [1], [0, 0, 1, 1], [], []>} : vector<8x32xbf16>, vector<32x32xbf16>, vector<8x32xf32> -> vector<8x32xf32>
      %c2_16 = arith.constant 2 : index
      %c0_17 = arith.constant 0 : index
      %c0_18 = arith.constant 0 : index
      %20 = vector.load %arg2[%c2_16, %c0_17, %c0_18] : memref<3x32x32xbf16, #tpu.memory_space<vmem>>, vector<1x32x32xbf16>
      %21 = vector.shape_cast %20 : vector<1x32x32xbf16> to vector<32x32xbf16>
      %cst_19 = arith.constant dense<0.000000e+00> : vector<8x32xf32>
      %22 = tpu.matmul %4, %21, %cst_19 {dimension_numbers = #tpu.dot_dimension_numbers<[1], [0], [0], [1], [0, 0, 1, 1], [], []>} : vector<8x32xbf16>, vector<32x32xbf16>, vector<8x32xf32> -> vector<8x32xf32>
      %c0_20 = arith.constant 0 : index
      %c0_21 = arith.constant 0 : index
      %c0_22 = arith.constant 0 : index
      %23 = vector.load %arg3[%c0_20, %c0_21, %c0_22] : memref<4x1x32xf32, #tpu.memory_space<vmem>>, vector<1x1x32xf32>
      %24 = vector.shape_cast %23 : vector<1x1x32xf32> to vector<1x32xf32>
      %c1_23 = arith.constant 1 : index
      %c0_24 = arith.constant 0 : index
      %c0_25 = arith.constant 0 : index
      %25 = vector.load %arg3[%c1_23, %c0_24, %c0_25] : memref<4x1x32xf32, #tpu.memory_space<vmem>>, vector<1x1x32xf32>
      %26 = vector.shape_cast %25 : vector<1x1x32xf32> to vector<1x32xf32>
      %c2_26 = arith.constant 2 : index
      %c0_27 = arith.constant 0 : index
      %c0_28 = arith.constant 0 : index
      %27 = vector.load %arg3[%c2_26, %c0_27, %c0_28] : memref<4x1x32xf32, #tpu.memory_space<vmem>>, vector<1x1x32xf32>
      %28 = vector.shape_cast %27 : vector<1x1x32xf32> to vector<1x32xf32>
      %c3 = arith.constant 3 : index
      %c0_29 = arith.constant 0 : index
      %c0_30 = arith.constant 0 : index
      %29 = vector.load %arg3[%c3, %c0_29, %c0_30] : memref<4x1x32xf32, #tpu.memory_space<vmem>>, vector<1x1x32xf32>
      %30 = vector.shape_cast %29 : vector<1x1x32xf32> to vector<1x32xf32>
      %31 = arith.addf %7, %16 : vector<8x32xf32>
      %32 = vector.broadcast %24 : vector<1x32xf32> to vector<8x32xf32>
      %33 = arith.addf %31, %32 : vector<8x32xf32>
      %34 = arith.negf %33 : vector<8x32xf32>
      %35 = math.exp %34 : vector<8x32xf32>
      %cst_31 = arith.constant 1.000000e+00 : f32
      %36 = vector.broadcast %cst_31 : f32 to vector<8x32xf32>
      %37 = arith.addf %36, %35 : vector<8x32xf32>
      %38 = arith.divf %36, %37 : vector<8x32xf32>
      %39 = arith.addf %10, %19 : vector<8x32xf32>
      %40 = vector.broadcast %26 : vector<1x32xf32> to vector<8x32xf32>
      %41 = arith.addf %39, %40 : vector<8x32xf32>
      %42 = arith.negf %41 : vector<8x32xf32>
      %43 = math.exp %42 : vector<8x32xf32>
      %cst_32 = arith.constant 1.000000e+00 : f32
      %44 = vector.broadcast %cst_32 : f32 to vector<8x32xf32>
      %45 = arith.addf %44, %43 : vector<8x32xf32>
      %46 = arith.divf %44, %45 : vector<8x32xf32>
      %47 = vector.broadcast %28 : vector<1x32xf32> to vector<8x32xf32>
      %48 = arith.addf %13, %47 : vector<8x32xf32>
      %49 = vector.broadcast %30 : vector<1x32xf32> to vector<8x32xf32>
      %50 = arith.addf %22, %49 : vector<8x32xf32>
      %51 = arith.mulf %38, %50 : vector<8x32xf32>
      %52 = arith.addf %48, %51 : vector<8x32xf32>
      %53 = math.tanh %52 : vector<8x32xf32>
      %54 = arith.subf %arg9, %53 : vector<8x32xf32>
      %55 = arith.mulf %46, %54 : vector<8x32xf32>
      %56 = arith.addf %53, %55 : vector<8x32xf32>
      %57 = arith.truncf %arg10 : vector<8x32xf32> to vector<8x32xbf16>
      %58 = arith.truncf %56 : vector<8x32xf32> to vector<8x32xbf16>
      %c0_33 = arith.constant 0 : index
      %c0_34 = arith.constant 0 : index
      %c0_35 = arith.constant 0 : index
      %59 = vector.load %arg4[%c0_33, %c0_34, %c0_35] : memref<3x32x32xbf16, #tpu.memory_space<vmem>>, vector<1x32x32xbf16>
      %60 = vector.shape_cast %59 : vector<1x32x32xbf16> to vector<32x32xbf16>
      %cst_36 = arith.constant dense<0.000000e+00> : vector<8x32xf32>
      %61 = tpu.matmul %58, %60, %cst_36 {dimension_numbers = #tpu.dot_dimension_numbers<[1], [0], [0], [1], [0, 0, 1, 1], [], []>} : vector<8x32xbf16>, vector<32x32xbf16>, vector<8x32xf32> -> vector<8x32xf32>
      %c1_37 = arith.constant 1 : index
      %c0_38 = arith.constant 0 : index
      %c0_39 = arith.constant 0 : index
      %62 = vector.load %arg4[%c1_37, %c0_38, %c0_39] : memref<3x32x32xbf16, #tpu.memory_space<vmem>>, vector<1x32x32xbf16>
      %63 = vector.shape_cast %62 : vector<1x32x32xbf16> to vector<32x32xbf16>
      %cst_40 = arith.constant dense<0.000000e+00> : vector<8x32xf32>
      %64 = tpu.matmul %58, %63, %cst_40 {dimension_numbers = #tpu.dot_dimension_numbers<[1], [0], [0], [1], [0, 0, 1, 1], [], []>} : vector<8x32xbf16>, vector<32x32xbf16>, vector<8x32xf32> -> vector<8x32xf32>
      %c2_41 = arith.constant 2 : index
      %c0_42 = arith.constant 0 : index
      %c0_43 = arith.constant 0 : index
      %65 = vector.load %arg4[%c2_41, %c0_42, %c0_43] : memref<3x32x32xbf16, #tpu.memory_space<vmem>>, vector<1x32x32xbf16>
      %66 = vector.shape_cast %65 : vector<1x32x32xbf16> to vector<32x32xbf16>
      %cst_44 = arith.constant dense<0.000000e+00> : vector<8x32xf32>
      %67 = tpu.matmul %58, %66, %cst_44 {dimension_numbers = #tpu.dot_dimension_numbers<[1], [0], [0], [1], [0, 0, 1, 1], [], []>} : vector<8x32xbf16>, vector<32x32xbf16>, vector<8x32xf32> -> vector<8x32xf32>
      %c0_45 = arith.constant 0 : index
      %c0_46 = arith.constant 0 : index
      %c0_47 = arith.constant 0 : index
      %68 = vector.load %arg5[%c0_45, %c0_46, %c0_47] : memref<3x32x32xbf16, #tpu.memory_space<vmem>>, vector<1x32x32xbf16>
      %69 = vector.shape_cast %68 : vector<1x32x32xbf16> to vector<32x32xbf16>
      %cst_48 = arith.constant dense<0.000000e+00> : vector<8x32xf32>
      %70 = tpu.matmul %57, %69, %cst_48 {dimension_numbers = #tpu.dot_dimension_numbers<[1], [0], [0], [1], [0, 0, 1, 1], [], []>} : vector<8x32xbf16>, vector<32x32xbf16>, vector<8x32xf32> -> vector<8x32xf32>
      %c1_49 = arith.constant 1 : index
      %c0_50 = arith.constant 0 : index
      %c0_51 = arith.constant 0 : index
      %71 = vector.load %arg5[%c1_49, %c0_50, %c0_51] : memref<3x32x32xbf16, #tpu.memory_space<vmem>>, vector<1x32x32xbf16>
      %72 = vector.shape_cast %71 : vector<1x32x32xbf16> to vector<32x32xbf16>
      %cst_52 = arith.constant dense<0.000000e+00> : vector<8x32xf32>
      %73 = tpu.matmul %57, %72, %cst_52 {dimension_numbers = #tpu.dot_dimension_numbers<[1], [0], [0], [1], [0, 0, 1, 1], [], []>} : vector<8x32xbf16>, vector<32x32xbf16>, vector<8x32xf32> -> vector<8x32xf32>
      %c2_53 = arith.constant 2 : index
      %c0_54 = arith.constant 0 : index
      %c0_55 = arith.constant 0 : index
      %74 = vector.load %arg5[%c2_53, %c0_54, %c0_55] : memref<3x32x32xbf16, #tpu.memory_space<vmem>>, vector<1x32x32xbf16>
      %75 = vector.shape_cast %74 : vector<1x32x32xbf16> to vector<32x32xbf16>
      %cst_56 = arith.constant dense<0.000000e+00> : vector<8x32xf32>
      %76 = tpu.matmul %57, %75, %cst_56 {dimension_numbers = #tpu.dot_dimension_numbers<[1], [0], [0], [1], [0, 0, 1, 1], [], []>} : vector<8x32xbf16>, vector<32x32xbf16>, vector<8x32xf32> -> vector<8x32xf32>
      %c0_57 = arith.constant 0 : index
      %c0_58 = arith.constant 0 : index
      %c0_59 = arith.constant 0 : index
      %77 = vector.load %arg6[%c0_57, %c0_58, %c0_59] : memref<4x1x32xf32, #tpu.memory_space<vmem>>, vector<1x1x32xf32>
      %78 = vector.shape_cast %77 : vector<1x1x32xf32> to vector<1x32xf32>
      %c1_60 = arith.constant 1 : index
      %c0_61 = arith.constant 0 : index
      %c0_62 = arith.constant 0 : index
      %79 = vector.load %arg6[%c1_60, %c0_61, %c0_62] : memref<4x1x32xf32, #tpu.memory_space<vmem>>, vector<1x1x32xf32>
      %80 = vector.shape_cast %79 : vector<1x1x32xf32> to vector<1x32xf32>
      %c2_63 = arith.constant 2 : index
      %c0_64 = arith.constant 0 : index
      %c0_65 = arith.constant 0 : index
      %81 = vector.load %arg6[%c2_63, %c0_64, %c0_65] : memref<4x1x32xf32, #tpu.memory_space<vmem>>, vector<1x1x32xf32>
      %82 = vector.shape_cast %81 : vector<1x1x32xf32> to vector<1x32xf32>
      %c3_66 = arith.constant 3 : index
      %c0_67 = arith.constant 0 : index
      %c0_68 = arith.constant 0 : index
      %83 = vector.load %arg6[%c3_66, %c0_67, %c0_68] : memref<4x1x32xf32, #tpu.memory_space<vmem>>, vector<1x1x32xf32>
      %84 = vector.shape_cast %83 : vector<1x1x32xf32> to vector<1x32xf32>
      %85 = arith.addf %61, %70 : vector<8x32xf32>
      %86 = vector.broadcast %78 : vector<1x32xf32> to vector<8x32xf32>
      %87 = arith.addf %85, %86 : vector<8x32xf32>
      %88 = arith.negf %87 : vector<8x32xf32>
      %89 = math.exp %88 : vector<8x32xf32>
      %cst_69 = arith.constant 1.000000e+00 : f32
      %90 = vector.broadcast %cst_69 : f32 to vector<8x32xf32>
      %91 = arith.addf %90, %89 : vector<8x32xf32>
      %92 = arith.divf %90, %91 : vector<8x32xf32>
      %93 = arith.addf %64, %73 : vector<8x32xf32>
      %94 = vector.broadcast %80 : vector<1x32xf32> to vector<8x32xf32>
      %95 = arith.addf %93, %94 : vector<8x32xf32>
      %96 = arith.negf %95 : vector<8x32xf32>
      %97 = math.exp %96 : vector<8x32xf32>
      %cst_70 = arith.constant 1.000000e+00 : f32
      %98 = vector.broadcast %cst_70 : f32 to vector<8x32xf32>
      %99 = arith.addf %98, %97 : vector<8x32xf32>
      %100 = arith.divf %98, %99 : vector<8x32xf32>
      %101 = vector.broadcast %82 : vector<1x32xf32> to vector<8x32xf32>
      %102 = arith.addf %67, %101 : vector<8x32xf32>
      %103 = vector.broadcast %84 : vector<1x32xf32> to vector<8x32xf32>
      %104 = arith.addf %76, %103 : vector<8x32xf32>
      %105 = arith.mulf %92, %104 : vector<8x32xf32>
      %106 = arith.addf %102, %105 : vector<8x32xf32>
      %107 = math.tanh %106 : vector<8x32xf32>
      %108 = arith.subf %arg10, %107 : vector<8x32xf32>
      %109 = arith.mulf %100, %108 : vector<8x32xf32>
      %110 = arith.addf %107, %109 : vector<8x32xf32>
      %111 = arith.index_cast %arg8 : i32 to index
      %c0_71 = arith.constant 0 : index
      %c0_72 = arith.constant 0 : index
      %112 = vector.load %arg7[%111, %c0_71, %c0_72] : memref<8x8x32xf32, #tpu.memory_space<vmem>>, vector<1x8x32xf32>
      %113 = vector.shape_cast %112 : vector<1x8x32xf32> to vector<8x32xf32>
      %114 = vector.shape_cast %110 : vector<8x32xf32> to vector<1x8x32xf32>
      tpu.vector_store %arg7[%111, %c0_71, %c0_72], %114 {strides = array<i32>} : memref<8x8x32xf32, #tpu.memory_space<vmem>>, vector<1x8x32xf32>,
      scf.yield %56, %110 : vector<8x32xf32>, vector<8x32xf32>
    }
    %c8_i32_1 = arith.constant 8 : i32
    return
  }
  func.func @transform_0(%arg0: i32) -> (i32, i32, i32, i32) {
    %c0_i32 = arith.constant 0 : i32
    %c0_i32_0 = arith.constant 0 : i32
    %c0_i32_1 = arith.constant 0 : i32
    %c0_i32_2 = arith.constant 0 : i32
    return %c0_i32, %c0_i32_0, %arg0, %c0_i32_1 : i32, i32, i32, i32
  }
  func.func @transform_1(%arg0: i32) -> (i32, i32, i32) {
    %c0_i32 = arith.constant 0 : i32
    %c0_i32_0 = arith.constant 0 : i32
    %c0_i32_1 = arith.constant 0 : i32
    %c0_i32_2 = arith.constant 0 : i32
    return %c0_i32, %c0_i32_0, %c0_i32_1 : i32, i32, i32
  }
  func.func @transform_2(%arg0: i32) -> (i32, i32, i32) {
    %c0_i32 = arith.constant 0 : i32
    %c0_i32_0 = arith.constant 0 : i32
    %c0_i32_1 = arith.constant 0 : i32
    %c0_i32_2 = arith.constant 0 : i32
    return %c0_i32, %c0_i32_0, %c0_i32_1 : i32, i32, i32
  }
  func.func @transform_3(%arg0: i32) -> (i32, i32, i32) {
    %c0_i32 = arith.constant 0 : i32
    %c0_i32_0 = arith.constant 0 : i32
    %c0_i32_1 = arith.constant 0 : i32
    %c0_i32_2 = arith.constant 0 : i32
    return %c0_i32, %c0_i32_0, %c0_i32_1 : i32, i32, i32
  }
  func.func @transform_4(%arg0: i32) -> (i32, i32, i32) {
    %c0_i32 = arith.constant 0 : i32
    %c0_i32_0 = arith.constant 0 : i32
    %c0_i32_1 = arith.constant 0 : i32
    %c0_i32_2 = arith.constant 0 : i32
    return %c0_i32, %c0_i32_0, %c0_i32_1 : i32, i32, i32
  }
  func.func @transform_5(%arg0: i32) -> (i32, i32, i32) {
    %c0_i32 = arith.constant 0 : i32
    %c0_i32_0 = arith.constant 0 : i32
    %c0_i32_1 = arith.constant 0 : i32
    %c0_i32_2 = arith.constant 0 : i32
    return %c0_i32, %c0_i32_0, %c0_i32_1 : i32, i32, i32
  }
  func.func @transform_6(%arg0: i32) -> (i32, i32, i32) {
    %c0_i32 = arith.constant 0 : i32
    %c0_i32_0 = arith.constant 0 : i32
    %c0_i32_1 = arith.constant 0 : i32
    return %c0_i32, %arg0, %c0_i32_0 : i32, i32, i32
  }
}

</mosaic_0001>

<bundles_post_ra>
// kernel: tpu_custom_call.1
= control target key start
LH: loop header
LB: loop body
LE: loop exit
PB: predicated region body
PF: predicated region fallthrough
CT: control target
= control target key end

     0   :  { %11 = vsyncpa [#allocation3], 0  ;;  %s1372_s0 = inlined_call_operand.hbm [shape: f32[3,8,8,32], index: 0, kind: input, shape index: {}]   ;;  %s1373_s1 = inlined_call_operand.hbm [shape: bf16[3,32,32], index: 1, kind: input, shape index: {}]   ;;  %s1374_s2 = inlined_call_operand.vmem [shape: f32[4,1,32], index: 2, kind: input, shape index: {}]   ;;  %s1375_s3 = inlined_call_operand.hbm [shape: bf16[3,32,32], index: 3, kind: input, shape index: {}]   ;;  %s1376_s4 = inlined_call_operand.hbm [shape: bf16[3,32,32], index: 4, kind: input, shape index: {}]   ;;  %s1377_s5 = inlined_call_operand.vmem [shape: f32[4,1,32], index: 5, kind: input, shape index: {}]   ;;  %s1378_s6 = inlined_call_operand.hbm [shape: f32[8,8,32], index: 6, kind: output, shape index: {}]  }
   0x1   :  { %12 = vsyncpa [#allocation6], 0 }
   0x2   :  { %13 = vsyncpa [#allocation9], 0 }
   0x3   :  { %14 = vsyncpa [#allocation4], 0  ;;  %s1131_s21 = smov [#allocation5]   ;;  %s989_s25 = scalar_lea.hbm %s1373_s1, 768 }
   0x4   :  { %s32_s22 = sshll.u32 %s1131_s21, 4  ;;  %p990_p0 = scmp.ne.s32.totalorder %s1373_s1, %s989_s25  ;;  %s33_s22 = int_to_ptr.vmem [resolvable:$true] %s32_s22 }
   0x5   :  { %p993_p1 = scmp.lt.u32.totalorder %s989_s25, %s1373_s1 }
   0x7   :  { %p995_p2 = pnand %p993_p1, %p990_p0 }
   0x9   :  { %998 = shalt.err (!%p995_p2)
}
   0xa   :  { %s999_s30 = scalar_lea.vmem %s33_s22, 768  ;;  %p1004_p4 = scmp.lt.s32.totalorder %s33_s22, %s33_s22 }
   0xb   :  { %p1000_p3 = scmp.ne.s32.totalorder %s33_s22, %s999_s30  ;;  %p1005_p5 = scmp.lt.s32.totalorder %s999_s30, %s999_s30 }
   0xd   :  { %p1006_p6 = por %p1005_p5, %p1004_p4 }
   0xf   :  { %p1007_p7 = pnand %p1006_p6, %p1000_p3 }
  0x11   :  { %1010 = shalt.err (!%p1007_p7)
}
  0x12   :  { %s1132_s7 = smov 64   ;;  %s1133_s8 = smov 4  }
  0x13   :  { %38 = dma.hbm_to_vmem [thread:$0]  %s1373_s1, 768, %s33_s22, [#allocation6], %s1132_s7, %s1132_s7, %s1133_s8  }
  0x14   :  { %s1134_s11 = smov [#allocation2]   ;;  %s1011_s15 = scalar_lea.hbm %s1372_s0, 3072 }
  0x15   :  { %s20_s12 = sshll.u32 %s1134_s11, 4  ;;  %p1012_p8 = scmp.ne.s32.totalorder %s1372_s0, %s1011_s15  ;;  %s21_s12 = int_to_ptr.vmem [resolvable:$true] %s20_s12 }
  0x16   :  { %p1015_p9 = scmp.lt.u32.totalorder %s1011_s15, %s1372_s0 }
  0x18   :  { %p1017_p10 = pnand %p1015_p9, %p1012_p8 }
  0x1a   :  { %1020 = shalt.err (!%p1017_p10)
}
  0x1b   :  { %s1021_s20 = scalar_lea.vmem %s21_s12, 3072  ;;  %p1026_p12 = scmp.lt.s32.totalorder %s21_s12, %s21_s12 }
  0x1c   :  { %p1022_p11 = scmp.ne.s32.totalorder %s21_s12, %s1021_s20  ;;  %p1027_p13 = scmp.lt.s32.totalorder %s1021_s20, %s1021_s20 }
  0x1e   :  { %p1028_p0 = por %p1027_p13, %p1026_p12 }
  0x20   :  { %p1029_p1 = pnand %p1028_p0, %p1022_p11 }
  0x22   :  { %1032 = shalt.err (!%p1029_p1)
}
  0x23   :  { %s1135_s1 = smov 128   ;;  %s1136_s21 = smov 8  }
  0x24   :  { %26 = dma.hbm_to_vmem [thread:$0]  %s1372_s0, 3072, %s21_s12, [#allocation3], %s1135_s1, %s1135_s1, %s1136_s21  }
  0x25   :  { %s1137_s24 = smov [#allocation7]   ;;  %s1138_s26 = smov [#allocation8]  }
  0x26   :  { %s46_s25 = sshll.u32 %s1137_s24, 4  ;;  %s58_s27 = sshll.u32 %s1138_s26, 4  ;;  %s47_s25 = int_to_ptr.vmem [resolvable:$true] %s46_s25  ;;  %s1207_s27 = int_to_ptr.vmem [resolvable:$true] %s58_s27 }
  0x27   :  { %s1033_s30 = scalar_lea.hbm %s1375_s3, 768 }
  0x28   :  { %p1034_p2 = scmp.ne.s32.totalorder %s1375_s3, %s1033_s30  ;;  %p1037_p3 = scmp.lt.u32.totalorder %s1033_s30, %s1375_s3 }
  0x2a   :  { %p1039_p4 = pnand %p1037_p3, %p1034_p2 }
  0x2c   :  { %1042 = shalt.err (!%p1039_p4)
}
  0x2d   :  { %s1043_s0 = scalar_lea.vmem %s47_s25, 768  ;;  %p1048_p6 = scmp.lt.s32.totalorder %s47_s25, %s47_s25 }
  0x2e   :  { %p1044_p5 = scmp.ne.s32.totalorder %s47_s25, %s1043_s0  ;;  %p1049_p7 = scmp.lt.s32.totalorder %s1043_s0, %s1043_s0 }
  0x30   :  { %p1050_p8 = por %p1049_p7, %p1048_p6 }
  0x32   :  { %p1051_p9 = pnand %p1050_p8, %p1044_p5 }
  0x34   :  { %1054 = shalt.err (!%p1051_p9)
}
  0x35   :  { %52 = dma.hbm_to_vmem [thread:$0]  %s1375_s3, 768, %s47_s25, [#allocation6], %s1132_s7, %s1132_s7, %s1133_s8  }
  0x36   :  { %s1055_s17 = scalar_lea.hbm %s1376_s4, 768 }
  0x37   :  { %p1056_p10 = scmp.ne.s32.totalorder %s1376_s4, %s1055_s17  ;;  %p1059_p11 = scmp.lt.u32.totalorder %s1055_s17, %s1376_s4 }
  0x39   :  { %p1061_p12 = pnand %p1059_p11, %p1056_p10 }
  0x3b   :  { %1064 = shalt.err (!%p1061_p12)
}
  0x3c   :  { %s1065_s23 = scalar_lea.vmem %s1207_s27, 768  ;;  %p1070_p0 = scmp.lt.s32.totalorder %s1207_s27, %s1207_s27 }
  0x3d   :  { %p1066_p13 = scmp.ne.s32.totalorder %s1207_s27, %s1065_s23  ;;  %p1071_p1 = scmp.lt.s32.totalorder %s1065_s23, %s1065_s23 }
  0x3f   :  { %p1072_p2 = por %p1071_p1, %p1070_p0 }
  0x41   :  { %p1073_p3 = pnand %p1072_p2, %p1066_p13 }
  0x43   :  { %1076 = shalt.err (!%p1073_p3)
}
  0x44   :  { %64 = dma.hbm_to_vmem [thread:$0]  %s1376_s4, 768, %s1207_s27, [#allocation9], %s1132_s7, %s1132_s7, %s1133_s8  }
  0x45   :  { %1111 = dma.done.wait [#allocation3], 3072  }
  0x46   :  { %1112 = vsyncadd [#allocation3], 4294964224 }
  0x47   :  { %1113 = dma.done.wait [#allocation6], 1536  }
  0x48   :  { %1114 = vsyncadd [#allocation6], 4294965760 }
  0x49   :  { %1115 = dma.done.wait [#allocation9], 768  }
  0x4a   :  { %1116 = vsyncadd [#allocation9], 4294966528  ;;  %v1244_v0 = vmov 0.0   ;;  %v1246_v1 = vmov 0.0   ;;  %s1248_s25 = smov 0  }
  0x4b LB: > { %v951_v2 = vld [vmem:[#allocation5] sm:$0xff]   ;;  %v1139_v3 = vmov 0.0   ;;  %v952_v4 = vld [vmem:[#allocation5 + $0x8] sm:$0xff]   ;;  %vm1140_vm0 = vmmov 0   ;;  %v953_v5 = vld [vmem:[#allocation5 + $0x10] sm:$0xff]   ;;  %v88_v7 = vpack.c.bf16 %v1125_v1, %v1125_v1  ;;  %vm114_vm1 = vcmask 261120   ;;  %s1129_s25 = sphi %s1248_s25, %s85_s25   ;;  %v1125_v1 = vphi %v1246_v1, %v1318_v1   ;;  %v1121_v0 = vphi %v1244_v0, %v724_v0  }
  0x4c   : > { %844 = vmatprep.subr.bf16.mxu0 %v1139_v3  ;;  %852 = vmatprep.subr.bf16.mxu1 %v1139_v3  ;;  %v954_v6 = vld [vmem:[#allocation5 + $0x18] sm:$0xff]   ;;  %v955_v8 = vld [vmem:[#allocation5 + $0x20] sm:$0xff]   ;;  %v956_v9 = vld [vmem:[#allocation5 + $0x28] sm:$0xff]   ;;  %v1286_v13 = vpack.c.bf16 %v1121_v0, %v1121_v0  ;;  %s767_s4 = sshll.u32 %s1129_s25, 3  ;;  %s85_s25 = sadd.s32 1, %s1129_s25  }
  0x4d   : > { %845 = vmatpush3.bf16.msra.mxu0 %v951_v2  ;;  %848 = vmatprep.mubr.msk.bf16.mxu0 %vm1140_vm0, %v1139_v3  ;;  %v957_v10 = vld [vmem:[#allocation8] sm:$0xff]   ;;  %v958_v11 = vld [vmem:[#allocation8 + $0x10] sm:$0xff]   ;;  %v959_v12 = vld [vmem:[#allocation8 + $0x8] sm:$0xff]   ;;  %s90_s7 = scalar_lea.vmem [#allocation2], %s767_s4  ;;  %s725_s18 = scalar_lea.vmem [#allocation10], %s767_s4 }
  0x4e   : > { %846 = vmatprep.subr.bf16.mxu0 %v1139_v3  ;;  %856 = vmatprep.mubr.msk.bf16.mxu1 %vm1140_vm0, %v1139_v3  ;;  %v960_v14 = vld [vmem:[#allocation8 + $0x18] sm:$0xff]   ;;  %v961_v15 = vld [vmem:[#allocation7] sm:$0xff]   ;;  %v962_v16 = vld [vmem:[#allocation7 + $0x10] sm:$0xff]   ;;  %p82_p4 = scmp.ge.s32.totalorder %s85_s25, 8  }
  0x4f   : > { %853 = vmatpush3.bf16.msra.mxu1 %v953_v5  ;;  %v963_v17 = vld [vmem:[#allocation7 + $0x8] sm:$0xff]   ;;  %v964_v18 = vld [vmem:[#allocation7 + $0x18] sm:$0xff]   ;;  %v91_v19 = vld [vmem:[%s90_s7] sm:$0xff]  ;;  %s1141_s19 = smov (%p82_p4), [#allocation10]  }
  0x50   : > { %854 = vmatprep.subr.bf16.mxu1 %v1139_v3  ;;  %v781_v21 = vld [vmem:[%s1374_s2] ss:$0 sm:$0xff]  ;;  %v783_v34 = vld [vmem:[%s1374_s2 + $0x1] ss:$0 sm:$0xff]  ;;  %v786_v43 = vld [vmem:[%s1374_s2 + $0x3] ss:$0 sm:$0xff] }
  0x51   : > { %847 = vmatpush3.bf16.msra.mxu0 %v952_v4  ;;  %v769_v25 = vld [vmem:[%s90_s7 + $0x40] sm:$0xff]  ;;  %v965_v57 = vld [vmem:[#allocation7 + $0x20] sm:$0xff]   ;;  %v966_v60 = vld [vmem:[#allocation7 + $0x28] sm:$0xff]   ;;  %s732_s20 = sshll.u32 (%p82_p4), %s1141_s19, 4  ;;  %s733_s20 = int_to_ptr.vmem [resolvable:$true] %s732_s20 }
  0x52   : > { %860 = vmatprep.subr.bf16.mxu0 %v1139_v3  ;;  %v771_v44 = vld [vmem:[%s90_s7 + $0x80] sm:$0xff]  ;;  %v968_v61 = vld [vmem:[#allocation8 + $0x28] sm:$0xff]   ;;  %s1077_s22 = scalar_lea.vmem (%p82_p4), %s733_s20, 1024  ;;  %p1082_p6 = scmp.lt.s32.totalorder (%p82_p4), %s733_s20, %s733_s20 }
  0x53   : > { %855 = vmatpush3.bf16.msra.mxu1 %v954_v6  ;;  %v785_v45 = vld [vmem:[%s1374_s2 + $0x2] ss:$0 sm:$0xff]  ;;  %p1078_p5 = scmp.ne.s32.totalorder (%p82_p4), %s733_s20, %s1077_s22  ;;  %p1083_p7 = scmp.lt.s32.totalorder (%p82_p4), %s1077_s22, %s1077_s22 }
  0x54   : > { %849 = vmatmul.mubr.msk.bf16.vlgmr.msra.gmra.mrb[0].mxu0 %vm114_vm1, %v88_v7  ;;  %868 = vmatprep.subr.bf16.mxu1 %v1139_v3  ;;  %v261_v48 = vadd.f32 %v785_v45, %v771_v44  ;;  %v967_v59 = vld [vmem:[#allocation8 + $0x20] sm:$0xff]  }
  0x55   : > { %861 = vmatpush3.bf16.msra.mxu0 %v955_v8  ;;  %864 = vmatprep.mubr.msk.bf16.mxu0 %vm1140_vm0, %v1139_v3  ;;  %p1084_p8 = por (%p82_p4), %p1083_p7, %p1082_p6 }
  0x56   : > { %857 = vmatmul.mubr.msk.bf16.vlgmr.msra.gmra.mrb[0].mxu1 %vm114_vm1, %v88_v7  ;;  %862 = vmatprep.subr.bf16.mxu0 %v1139_v3 }
  0x57   : > { %872 = vmatprep.mubr.msk.bf16.mxu1 %vm1140_vm0, %v1139_v3  ;;  %869 = vmatpush3.bf16.msra.mxu1 %v957_v10  ;;  %p1085_p9 = pnand (%p82_p4), %p1084_p8, %p1078_p5 }
  0x58   : > { %870 = vmatprep.subr.bf16.mxu1 %v1139_v3 }
  0x59   : > { %863 = vmatpush3.bf16.msra.mxu0 %v956_v9  ;;  %v802_v9 = vld [vmem:[%s1377_s5] ss:$0 sm:$0xff] }
  0x5a   : > { %876 = vmatprep.subr.bf16.mxu0 %v1139_v3 }
  0x5b   : > { %871 = vmatpush3.bf16.msra.mxu1 %v959_v12 }
  0x5c   : > { %865 = vmatmul.mubr.msk.bf16.vlgmr.msra.gmra.mrb[4].mxu0 %vm114_vm1, %v88_v7  ;;  %884 = vmatprep.subr.bf16.mxu1 %v1139_v3 }
  0x5d   : > { %880 = vmatprep.mubr.msk.bf16.mxu0 %vm1140_vm0, %v1139_v3  ;;  %877 = vmatpush3.bf16.msra.mxu0 %v958_v11 }
  0x5e   : > { %878 = vmatprep.subr.bf16.mxu0 %v1139_v3  ;;  %873 = vmatmul.mubr.msk.bf16.vlgmr.msra.gmra.mrb[4].mxu1 %vm114_vm1, %v1286_v13 }
  0x5f   : > { %888 = vmatprep.mubr.msk.bf16.mxu1 %vm1140_vm0, %v1139_v3  ;;  %885 = vmatpush3.bf16.msra.mxu1 %v961_v15 }
  0x60   : > { %886 = vmatprep.subr.bf16.mxu1 %v1139_v3 }
  0x61   : > { %879 = vmatpush3.bf16.msra.mxu0 %v960_v14 }
  0x62   : > { %892 = vmatprep.subr.bf16.mxu0 %v1139_v3 }
  0x63   : > { %887 = vmatpush3.bf16.msra.mxu1 %v963_v17 }
  0x64   : > { %881 = vmatmul.mubr.msk.bf16.vlgmr.msra.gmra.mrb[8].mxu0 %vm114_vm1, %v1286_v13  ;;  %900 = vmatprep.subr.bf16.mxu1 %v1139_v3 }
  0x65   : > { %893 = vmatpush3.bf16.msra.mxu0 %v962_v16  ;;  %896 = vmatprep.mubr.msk.bf16.mxu0 %vm1140_vm0, %v1139_v3 }
  0x66   : > { %894 = vmatprep.subr.bf16.mxu0 %v1139_v3 }
  0x69   : > { %895 = vmatpush3.bf16.msra.mxu0 %v964_v18 }
  0x6a   : > { %908 = vmatprep.subr.bf16.mxu0 %v1139_v3 }
 0x127   : > { %v152_v20 = vpop.f32.mrb[0].mxu0 }
 0x128   : > { %v227_v22 = vadd.f32 %v152_v20, %v91_v19  ;;  %v850_v23 = vpop.f32.mrb[1].mxu0 }
 0x129   : > { %v155_v24 = vpop.f32.mrb[2].mxu0  ;;  %v209_v26 = vpop.f32.mrb[0].mxu1 }
 0x12a   : > { %v234_v27 = vadd.f32 %v781_v21, %v227_v22  ;;  %v851_v28 = vpop.f32.mrb[3].mxu0  ;;  %v858_v29 = vpop.f32.mrb[1].mxu1  ;;  %v241_v32 = vadd.f32 %v769_v25, %v209_v26  ;;  %v807_v21 = vld [vmem:[%s1377_s5 + $0x1] ss:$0 sm:$0xff] }
 0x12b   : > { %v212_v30 = vpop.f32.mrb[2].mxu1 }
 0x12c   : > { %v782_v31 = vmul.f32 -1.442695, %v234_v27  ;;  %v859_v33 = vpop.f32.mrb[3].mxu1  ;;  %v248_v36 = vadd.f32 %v783_v34, %v241_v32  ;;  %v813_v34 = vld [vmem:[%s1377_s5 + $0x3] ss:$0 sm:$0xff] }
 0x12e   : > { %969 = vpow2.f32 %v782_v31  ;;  %v784_v40 = vmul.f32 -1.442695, %v248_v36  ;;  %v809_v36 = vld [vmem:[%s1377_s5 + $0x2] ss:$0 sm:$0xff] }
 0x12f   : > { %v314_v35 = vpop.f32.mrb[4].mxu0 }
 0x130   : > { %v866_v37 = vpop.f32.mrb[5].mxu0  ;;  %971 = vpow2.f32 %v784_v40  ;;  %v315_v47 = vadd.f32 %v786_v43, %v314_v35 }
 0x131   : > { %v317_v38 = vpop.f32.mrb[6].mxu0  ;;  %v395_v62 = vpop.f32.mrb[4].mxu1 }
 0x132   : > { %v867_v39 = vpop.f32.mrb[7].mxu0  ;;  %v874_v63 = vpop.f32.mrb[5].mxu1 }
 0x133   : > { %v398_v2 = vpop.f32.mrb[6].mxu1 }
 0x134   : > { %v875_v4 = vpop.f32.mrb[7].mxu1 }
 0x137   : > { %v452_v5 = vpop.f32.mrb[8].mxu0 }
 0x138   : > { %v970_v41 = vpop.eup %969  ;;  %v882_v6 = vpop.f32.mrb[9].mxu0 }
 0x139   : > { %v238_v42 = vadd.f32 1.0, %v970_v41  ;;  %v455_v7 = vpop.f32.mrb[10].mxu0 }
 0x13a   : > { %v972_v46 = vpop.eup %971  ;;  %v883_v8 = vpop.f32.mrb[11].mxu0 }
 0x13b   : > { %973 = vrcp.f32 %v238_v42  ;;  %v252_v50 = vadd.f32 1.0, %v972_v46 }
 0x13d   : > { %975 = vrcp.f32 %v252_v50 }
 0x145   : > { %v974_v49 = vpop.eup %973 }
 0x146   : > { %v320_v51 = vmul.f32 %v974_v49, %v315_v47 }
 0x147   : > { %v976_v53 = vpop.eup %975 }
 0x148   : > { %v321_v52 = vadd.f32 %v320_v51, %v261_v48 }
 0x14a   : > { %977 = vtanh.f32 %v321_v52 }
 0x154   : > { %v978_v54 = vpop.eup %977 }
 0x155   : > { %v323_v55 = vsub.f32 %v1125_v1, %v978_v54 }
 0x157   : > { %v324_v56 = vmul.f32 %v976_v53, %v323_v55 }
 0x159   : > { %v1318_v1 = vadd.f32 %v978_v54, %v324_v56  }
 0x15b   : > { %v327_v58 = vpack.c.bf16 %v1318_v1, %v1318_v1 }
 0x15d   : > { %889 = vmatmul.mubr.msk.bf16.vlgmr.msra.gmra.mrb[8].mxu1 %vm114_vm1, %v327_v58  ;;  %897 = vmatmul.mubr.msk.bf16.vlgmr.msra.gmra.mrb[12].mxu0 %vm114_vm1, %v327_v58 }
 0x15e   : > { %901 = vmatpush3.bf16.msra.mxu1 %v965_v57  ;;  %904 = vmatprep.mubr.msk.bf16.mxu1 %vm1140_vm0, %v1139_v3 }
 0x15f   : > { %902 = vmatprep.subr.bf16.mxu1 %v1139_v3  ;;  %909 = vmatpush3.bf16.msra.mxu0 %v967_v59 }
 0x160   : > { %910 = vmatprep.subr.bf16.mxu0 %v1139_v3  ;;  %912 = vmatprep.mubr.msk.bf16.mxu0 %vm1140_vm0, %v1139_v3 }
 0x162   : > { %903 = vmatpush3.bf16.msra.mxu1 %v966_v60 }
 0x163   : > { %911 = vmatpush3.bf16.msra.mxu0 %v968_v61 }
 0x165   : > { %905 = vmatmul.mubr.msk.bf16.vlgmr.msra.gmra.mrb[12].mxu1 %vm114_vm1, %v327_v58 }
 0x166   : > { %913 = vmatmul.mubr.msk.bf16.vlgmr.msra.gmra.mrb[16].mxu0 %vm114_vm1, %v1286_v13 }
 0x230   : > { %v519_v3 = vpop.f32.mrb[8].mxu1  ;;  %v584_v10 = vpop.f32.mrb[12].mxu0 }
 0x231   : > { %v520_v11 = vadd.f32 %v519_v3, %v395_v62  ;;  %v585_v12 = vadd.f32 %v584_v10, %v452_v5  ;;  %v890_v14 = vpop.f32.mrb[9].mxu1  ;;  %v898_v15 = vpop.f32.mrb[13].mxu0 }
 0x232   : > { %v522_v16 = vpop.f32.mrb[10].mxu1  ;;  %v587_v13 = vpop.f32.mrb[14].mxu0 }
 0x233   : > { %v531_v17 = vadd.f32 %v802_v9, %v520_v11  ;;  %v891_v18 = vpop.f32.mrb[11].mxu1  ;;  %v899_v19 = vpop.f32.mrb[15].mxu0  ;;  %v596_v27 = vadd.f32 %v807_v21, %v585_v12 }
 0x235   : > { %v803_v20 = vmul.f32 -1.442695, %v531_v17  ;;  %v808_v31 = vmul.f32 -1.442695, %v596_v27 }
 0x237   : > { %979 = vpow2.f32 %v803_v20 }
 0x238   : > { %v655_v22 = vpop.f32.mrb[12].mxu1  ;;  %981 = vpow2.f32 %v808_v31 }
 0x239   : > { %v906_v23 = vpop.f32.mrb[13].mxu1  ;;  %v713_v24 = vpop.f32.mrb[16].mxu0  ;;  %v656_v39 = vadd.f32 %v809_v36, %v655_v22 }
 0x23a   : > { %v658_v25 = vpop.f32.mrb[14].mxu1  ;;  %v914_v26 = vpop.f32.mrb[17].mxu0  ;;  %v714_v35 = vadd.f32 %v813_v34, %v713_v24 }
 0x23b   : > { %v907_v28 = vpop.f32.mrb[15].mxu1  ;;  %v716_v29 = vpop.f32.mrb[18].mxu0 }
 0x23c   : > { %v915_v30 = vpop.f32.mrb[19].mxu0 }
 0x241   : > { %v980_v32 = vpop.eup %979 }
 0x242   : > { %v535_v33 = vadd.f32 1.0, %v980_v32  ;;  %v982_v37 = vpop.eup %981 }
 0x243   : > { %v600_v41 = vadd.f32 1.0, %v982_v37 }
 0x244   : > { %983 = vrcp.f32 %v535_v33 }
 0x24e   : > { %v984_v38 = vpop.eup %983 }
 0x24f   : > { %v719_v40 = vmul.f32 %v984_v38, %v714_v35 }
 0x251   : > { %v720_v42 = vadd.f32 %v719_v40, %v656_v39 }
 0x253   : > { %985 = vtanh.f32 %v720_v42 }
 0x254   : > { %987 = vrcp.f32 %v600_v41 }
 0x25d   : > { %v986_v43 = vpop.eup %985 }
 0x25e   : > { %v722_v44 = vsub.f32 %v1121_v0, %v986_v43  ;;  %v988_v45 = vpop.eup %987  ;;  %84 = sbr.rel (!%p82_p4) target bundleno = 75 (0x4b), region = 83 }
 0x260   : > { %v723_v46 = vmul.f32 %v988_v45, %v722_v44 }
 0x262   : > { %v724_v0 = vadd.f32 %v986_v43, %v723_v46  }
 0x264   : > { %726 = vst.msk [vmem:[%s725_s18] sm:$0xff] %vm114_vm1, %v724_v0 }
 0x265   :  { %1088 = shalt.err (!%p1085_p9)
}
 0x266   :  { %s1089_s24 = scalar_lea.hbm %s1378_s6, 1024 }
 0x267   :  { %p1090_p10 = scmp.ne.s32.totalorder %s1378_s6, %s1089_s24  ;;  %p1093_p11 = scmp.lt.u32.totalorder %s1089_s24, %s1378_s6 }
 0x269   :  { %p1095_p12 = pnand %p1093_p11, %p1090_p10 }
 0x26b   :  { %1098 = shalt.err (!%p1095_p12)
}
 0x26c   :  { %738 = dma.vmem_to_hbm [thread:$0]  %s733_s20, 1024, %s1378_s6, [#allocation4], %s1135_s1, %s1135_s1, %s1136_s21  }
 0x26d   :  { %1117 = dma.done.wait [#allocation4], 1024  }
 0x26e   :  { %1118 = vsyncadd [#allocation4], 4294966272 }
 0x26f   :  { %742 = vsyncpa [#allocation3], 1 }
 0x270   :  { %743 = vsyncpa [#allocation6], 1 }
 0x271   :  { %744 = vsyncpa [#allocation9], 1 }
 0x272   :  { %745 = vsyncpa [#allocation4], 1 }

</bundles_post_ra>
